<compile_context>
chip_gen: v5e
topology: v5e:2x2
jax: 0.10.0
libtpu: 0.0.40
codegen_flags: <defaults>
</compile_context>

<pallas_src>
import functools

import jax
import jax.numpy as jnp
from jax.experimental import pallas as pl
from jax.experimental.pallas import tpu as pltpu


def _erp2igd_kernel(xg_ref, w_ref, b_ref, o_ref):
    """Depthwise (1,K) conv + bias + ReLU over gathered neighbors.

    xg_ref: (tc, K, mm)  gathered inputs for one (batch, channel-tile, face)
    w_ref : (tc, K, 1)   depthwise conv weights
    b_ref : (tc, 1)      depthwise conv bias
    o_ref : (tc, mm)     output tile (channels on sublanes, cells on lanes)
    """
    x = xg_ref[...]                                         # (tc, K, mm)
    acc = jnp.sum(x * w_ref[...], axis=1)                   # (tc, mm) sublane reduce over K
    acc = acc + b_ref[...]                                   # + bias[c] (lane broadcast)
    o_ref[...] = jnp.maximum(acc, 0.0).astype(o_ref.dtype)   # ReLU


def _pick_channel_tile(C, K, mm, itemsize, budget_bytes=2 << 20):
    """Largest channel tile that divides C, keeps the per-step input block under
    `budget_bytes`, and is sublane-aligned (multiple of 8) unless it equals C
    (full-extent blocks are exempt from the (8,128) rule)."""
    if C * K * mm * itemsize <= budget_bytes:
        return C
    for tc in range(C, 0, -1):
        if C % tc == 0 and tc % 8 == 0 and tc * K * mm * itemsize <= budget_bytes:
            return tc
    return C  # fallback: full C (correct; only hit for awkward channel counts)


@functools.partial(jax.jit, static_argnums=(4,))
def erp2igd_encoder_forward(x, codeskmin, weight, bias, dggrid_level):
    """x: (B, C, H, W) float32 (NCHW, as in PyTorch). Returns (B*10, C, m, m)."""
    B, C, H, W = x.shape
    N, K = codeskmin.shape
    m = 2 ** dggrid_level
    mm = m * m
    Q = 10
    assert N == Q * mm

    # --- glue: flatten + gather of K nearest ERP pixels per IGD cell --------
    # Rearrange the (tiny, int32) index table so the gather directly produces
    # the kernel layout (B, C, Q, K, mm); no HBM transpose of the big tensor.
    x_flat = x.reshape(B, C, H * W)
    idx = jnp.transpose(codeskmin.astype(jnp.int32).reshape(Q, mm, K), (0, 2, 1))  # (Q, K, mm)
    xg = jnp.take(x_flat, idx, axis=2)                                              # (B, C, Q, K, mm)

    w = weight.reshape(C, K, 1).astype(x.dtype)
    b = bias.reshape(C, 1).astype(x.dtype)

    tc = _pick_channel_tile(C, K, mm, jnp.dtype(x.dtype).itemsize)
    cg = C // tc

    out = pl.pallas_call(
        _erp2igd_kernel,
        out_shape=jax.ShapeDtypeStruct((B, Q, C, mm), x.dtype),
        grid=(B, cg, Q),  # Q innermost: weight/bias blocks stay resident across faces
        in_specs=[
            # (1, tc, 1, K, mm) block; batch and face dims squeezed away.
            pl.BlockSpec((None, tc, None, K, mm),
                         lambda bi, ci, qi: (bi, ci, qi, 0, 0)),
            pl.BlockSpec((tc, K, 1), lambda bi, ci, qi: (ci, 0, 0)),
            pl.BlockSpec((tc, 1), lambda bi, ci, qi: (ci, 0)),
        ],
        # output written directly in the rearranged (B, Q, C, mm) layout.
        out_specs=pl.BlockSpec((None, None, tc, mm),
                               lambda bi, ci, qi: (bi, qi, ci, 0)),
        compiler_params=pltpu.CompilerParams(
            dimension_semantics=("parallel", "parallel", "parallel")),
    )(xg, w, b)

    # --- glue: free view, 'b q c (h w) -> (b q) c h w' -----------------------
    return out.reshape(B * Q, C, m, m)


def _reference_forward(x, codeskmin, weight, bias, dggrid_level):
    """Pure-JAX reference mirroring the PyTorch forward (for verification)."""
    B, C, H, W = x.shape
    N, K = codeskmin.shape
    m = 2 ** dggrid_level
    x_flat = x.reshape(B, C, H * W)
    xg = jnp.take(x_flat, codeskmin, axis=2)              # (B, C, N, K)
    out = jnp.einsum("bcnk,ck->bcn", xg, weight) + bias[None, :, None]
    out = jnp.maximum(out, 0.0)
    out = out.reshape(B, C, 10, m, m)
    out = jnp.transpose(out, (0, 2, 1, 3, 4)).reshape(B * 10, C, m, m)
    return out


if __name__ == "__main__":
    # Small deterministic shapes consistent with the module:
    B, C, H, W = 2, 4, 16, 16          # batch, in_channels, ERP grid
    K = 8                              # k_size (8 nearest ERP neighbors)
    dggrid_level = 3                   # maxij = 8  ->  N = 10 * 64 = 640 cells
    m = 2 ** dggrid_level
    N = 10 * m * m

    key = jax.random.PRNGKey(0)
    k_x, k_idx, k_w, k_b = jax.random.split(key, 4)

    x = jax.random.normal(k_x, (B, C, H, W), dtype=jnp.float32)
    # synthetic 'codeskmin' lookup table (sorted-by-seqnum semantics are
    # irrelevant once materialized): N rows of K indices into the H*W pixels.
    codeskmin = jax.random.randint(k_idx, (N, K), 0, H * W, dtype=jnp.int32)
    # depthwise-conv parameters (torch weight (C,1,1,K) -> (C,K) here)
    weight = 0.1 * jax.random.normal(k_w, (C, K), dtype=jnp.float32)
    bias = 0.1 * jax.random.normal(k_b, (C,), dtype=jnp.float32)

    out = jax.block_until_ready(
        erp2igd_encoder_forward(x, codeskmin, weight, bias, dggrid_level))
    ref = jax.block_until_ready(
        _reference_forward(x, codeskmin, weight, bias, dggrid_level))

    assert out.shape == (B * 10, C, m, m), out.shape
    assert jnp.max(jnp.abs(out - ref)) < 1e-5, "mismatch vs reference"

    print("KERNEL_OK")
</pallas_src>

<mosaic_0001>
module attributes {stable_mosaic.version = 11 : i64} {
  func.func @_erp2igd_kernel(%arg0: i32, %arg1: i32, %arg2: i32, %arg3: memref<1x4x1x8x64xf32, #tpu.memory_space<vmem>>, %arg4: memref<4x8x1xf32, #tpu.memory_space<vmem>>, %arg5: memref<4x1xf32, #tpu.memory_space<vmem>>, %arg6: memref<1x1x4x64xf32, #tpu.memory_space<vmem>>) attributes {dimension_semantics = [#tpu.dimension_semantics<parallel>, #tpu.dimension_semantics<parallel>, #tpu.dimension_semantics<parallel>], iteration_bounds = array<i64: 2, 1, 10>, scalar_prefetch = 0 : i64, scratch_operands = 0 : i64, tpu.core_type = #tpu.core_type<tc>, window_params = [{transform_indices = @transform_0, window_bounds = array<i64: 1, 4, 1, 8, 64>}, {transform_indices = @transform_1, window_bounds = array<i64: 4, 8, 1>}, {transform_indices = @transform_2, window_bounds = array<i64: 4, 1>}, {transform_indices = @transform_3, window_bounds = array<i64: 1, 1, 4, 64>}]} {
    %c0 = arith.constant 0 : index
    %c0_0 = arith.constant 0 : index
    %c0_1 = arith.constant 0 : index
    %c0_2 = arith.constant 0 : index
    %c0_3 = arith.constant 0 : index
    %0 = vector.load %arg3[%c0, %c0_0, %c0_1, %c0_2, %c0_3] : memref<1x4x1x8x64xf32, #tpu.memory_space<vmem>>, vector<1x4x1x8x64xf32>
    %1 = vector.shape_cast %0 : vector<1x4x1x8x64xf32> to vector<4x8x64xf32>
    %c0_4 = arith.constant 0 : index
    %c0_5 = arith.constant 0 : index
    %c0_6 = arith.constant 0 : index
    %2 = vector.load %arg4[%c0_4, %c0_5, %c0_6] : memref<4x8x1xf32, #tpu.memory_space<vmem>>, vector<4x8x1xf32>
    %3 = vector.broadcast %2 : vector<4x8x1xf32> to vector<4x8x64xf32>
    %4 = arith.mulf %1, %3 : vector<4x8x64xf32>
    %cst = arith.constant dense<0.000000e+00> : vector<4x64xf32>
    %5 = vector.multi_reduction <add>, %4, %cst [1] : vector<4x8x64xf32> to vector<4x64xf32>
    %c0_7 = arith.constant 0 : index
    %c0_8 = arith.constant 0 : index
    %6 = vector.load %arg5[%c0_7, %c0_8] : memref<4x1xf32, #tpu.memory_space<vmem>>, vector<4x1xf32>
    %7 = vector.broadcast %6 : vector<4x1xf32> to vector<4x64xf32>
    %8 = arith.addf %5, %7 : vector<4x64xf32>
    %cst_9 = arith.constant 0.000000e+00 : f32
    %9 = vector.broadcast %cst_9 : f32 to vector<4x64xf32>
    %10 = arith.maximumf %8, %9 : vector<4x64xf32>
    %c0_10 = arith.constant 0 : index
    %c0_11 = arith.constant 0 : index
    %c0_12 = arith.constant 0 : index
    %c0_13 = arith.constant 0 : index
    %11 = vector.load %arg6[%c0_10, %c0_11, %c0_12, %c0_13] : memref<1x1x4x64xf32, #tpu.memory_space<vmem>>, vector<1x1x4x64xf32>
    %12 = vector.shape_cast %11 : vector<1x1x4x64xf32> to vector<4x64xf32>
    %13 = vector.shape_cast %10 : vector<4x64xf32> to vector<1x1x4x64xf32>
    tpu.vector_store %arg6[%c0_10, %c0_11, %c0_12, %c0_13], %13 {strides = array<i32>} : memref<1x1x4x64xf32, #tpu.memory_space<vmem>>, vector<1x1x4x64xf32>,
    return
  }
  func.func @transform_0(%arg0: i32, %arg1: i32, %arg2: i32) -> (i32, i32, i32, i32, i32) {
    %c0_i32 = arith.constant 0 : i32
    %c0_i32_0 = arith.constant 0 : i32
    %c0_i32_1 = arith.constant 0 : i32
    return %arg0, %arg1, %arg2, %c0_i32, %c0_i32_0 : i32, i32, i32, i32, i32
  }
  func.func @transform_1(%arg0: i32, %arg1: i32, %arg2: i32) -> (i32, i32, i32) {
    %c0_i32 = arith.constant 0 : i32
    %c0_i32_0 = arith.constant 0 : i32
    %c0_i32_1 = arith.constant 0 : i32
    return %arg1, %c0_i32, %c0_i32_0 : i32, i32, i32
  }
  func.func @transform_2(%arg0: i32, %arg1: i32, %arg2: i32) -> (i32, i32) {
    %c0_i32 = arith.constant 0 : i32
    %c0_i32_0 = arith.constant 0 : i32
    return %arg1, %c0_i32 : i32, i32
  }
  func.func @transform_3(%arg0: i32, %arg1: i32, %arg2: i32) -> (i32, i32, i32, i32) {
    %c0_i32 = arith.constant 0 : i32
    %c0_i32_0 = arith.constant 0 : i32
    return %arg0, %arg2, %arg1, %c0_i32 : i32, i32, i32, i32
  }
}

</mosaic_0001>

<bundles_post_ra>
// kernel: erp2igd_encoder_forward.1
= control target key start
LH: loop header
LB: loop body
LE: loop exit
PB: predicated region body
PF: predicated region fallthrough
CT: control target
= control target key end

     0   :  { %s685_s12 = smov 0   ;;  %s687_s13 = smov 0   ;;  %s795_s0 = inlined_call_operand.vmem [shape: f32[2,4,10,8,64], index: 0, kind: input, shape index: {}]   ;;  %s796_s1 = inlined_call_operand.vmem [shape: f32[4,8,1], index: 1, kind: input, shape index: {}]   ;;  %s797_s2 = inlined_call_operand.vmem [shape: f32[4,1], index: 2, kind: input, shape index: {}]   ;;  %s798_s3 = inlined_call_operand.vmem [shape: f32[2,10,4,64], index: 3, kind: output, shape index: {}]  }
   0x1   :  { %s689_s14 = smov 0   ;;  %s691_s15 = smov 0  }
   0x2   :  { %s693_s16 = smov 0   ;;  %s695_s17 = smov 0  }
   0x3   :  { %s697_s18 = smov 0  }
   0x4 LB: > { %s25_s19 = sadd.s32 1, %s654_s16  ;;  %s32_s20 = sadd.s32 1, %s658_s17  ;;  %s662_s18 = sphi %s697_s18, %s13_s18   ;;  %s658_s17 = sphi %s695_s17, %s804_s17   ;;  %s654_s16 = sphi %s693_s16, %s803_s16   ;;  %s650_s15 = sphi %s691_s15, %s802_s15   ;;  %s646_s14 = sphi %s689_s14, %s801_s14   ;;  %s642_s13 = sphi %s687_s13, %s800_s13   ;;  %s638_s12 = sphi %s685_s12, %s799_s12  }
   0x5   : > { %p26_p0 = scmp.ge.s32.totalorder %s25_s19, 10  ;;  %p50_p1 = scmp.ne.s32.totalorder %s642_s13, %s638_s12 }
   0x6   : > { %p51_p2 = scmp.eq.s32.totalorder %s662_s18, 0  ;;  %s43_s24 = sadd.s32 1, %s642_s13 }
   0x7   : > { %s806_s19 = smov (%p26_p0, %s25_s19), 0  ;;  %s808_s20 = smov (!%p26_p0, %s32_s20), %s658_s17 }
   0x8   : > { %p52_p3 = por %p51_p2, %p50_p1  ;;  %p34_p4 = scmp.ge.s32.totalorder %s808_s20, 2 }
   0x9   : > { %s39_s21 = ssub.s32 %s654_s16, %s806_s19  ;;  %p538_p6 = scmp.ge.s32.totalorder %s662_s18, 20 }
   0xa   : > { %s810_s20 = smov (%p34_p4, %s808_s20), 0 }
   0xb   : > { %s36_s22 = ssub.s32 %s658_s17, %s810_s20  ;;  %174 = sbr.rel (%p538_p6) target bundleno = 27 (0x1b), region = 24 }
   0xc   : > { %s40_s23 = sor.u32 %s39_s21, %s36_s22 }
   0xd   : > { %p41_p5 = scmp.eq.s32.totalorder %s40_s23, 0 }
   0xf   : > { %s736_s25 = scalar_select %p41_p5, %s642_s13, %s43_s24  }
  0x10   : > { %177 = sbr.rel (!%p52_p3) target bundleno = 27 (0x1b), region = 28  ;;  %s179_s26 = sand.u32 (%p52_p3), 1, %s642_s13  }
  0x11   : > { %s546_s27 = smul.u32 (%p52_p3), 40, %s658_s17  ;;  %s539_s28 = sshll.u32 (%p52_p3), %s179_s26, 5 }
  0x12   : > { %s181_s7 = scalar_lea.vmem (%p52_p3), [#allocation2], %s539_s28 }
  0x13   : > { %s186_s29 = sadd.s32 (%p52_p3), %s654_s16, %s546_s27 }
  0x14   : > { %s540_s30 = sshll.u32 (%p52_p3), %s186_s29, 3 }
  0x15   : > { %s188_s6 = scalar_lea.vmem %s795_s0, %s540_s30 }
  0x16   : > { %v223_v0 = vld [vmem:[%s188_s6] sm:$0xff]  ;;  %v225_v1 = vld [vmem:[%s188_s6 + $0x50] sm:$0xff] }
  0x17   : > { %v227_v2 = vld [vmem:[%s188_s6 + $0xa0] sm:$0xff]  ;;  %224 = vst [vmem:[%s181_s7] sm:$0xff] %v223_v0  ;;  %v229_v3 = vld [vmem:[%s188_s6 + $0xf0] sm:$0xff] }
  0x18   : > { %226 = vst [vmem:[%s181_s7 + $0x8] sm:$0xff] %v225_v1 }
  0x19   : > { %228 = vst [vmem:[%s181_s7 + $0x10] sm:$0xff] %v227_v2 }
  0x1a   : > { %230 = vst [vmem:[%s181_s7 + $0x18] sm:$0xff] %v229_v3 }
  0x1b PF: > { %p541_p7 = scmp.ge.s32.totalorder %s662_s18, 1  ;;  %p235_p8 = scmp.lt.s32.totalorder %s662_s18, 21 }
  0x1d   : > { %p236_p9 = pnand %p541_p7, %p235_p8 }
  0x1e   : > { %s242_s28 = sand.u32 (!%p236_p9), 1, %s638_s12   ;;  %p291_p10 = scmp.lt.s32.totalorder (!%p236_p9), %s650_s15, 1 }
  0x1f   : > { %239 = sbr.rel (%p236_p9) target bundleno = 185 (0xb9), region = 66  ;;  %s542_s29 = sshll.u32 (!%p236_p9), %s242_s28, 5 }
  0x20   : > { %s244_s30 = scalar_lea.vmem (!%p236_p9), [#allocation2], %s542_s29  ;;  %p293_p11 = scmp.lt.s32.totalorder (!%p236_p9), %s646_s14, 9 }
  0x24   : > { %v307_v4 = vld [vmem:[%s796_s1 + $0x8] sm:$0xff]  ;;  %v306_v5 = vld [vmem:[%s796_s1] sm:$0xff]  ;;  %v664_v6 = vmov 0   ;;  %v308_v8 = vld [vmem:[%s796_s1 + $0x10] sm:$0xff]  ;;  %vm334_vm0 = vcmask 523264   ;;  %s812_s15 = smov (!%p291_p10, %s650_s15), 1 }
  0x25   : > { %606 = vset.pattern.permute.xlu1 %v664_v6  ;;  %605 = vset.pattern.permute.xlu0 %v664_v6  ;;  %v363_v7 = vld [vmem:[%s797_s2] sm:$0xf]  ;;  %v309_v9 = vld [vmem:[%s796_s1 + $0x18] sm:$0xff]  ;;  %v303_v10 = vld [vmem:[%s244_s30 + $0x8] sm:$0xff]  ;;  %s814_s14 = smov (!%p293_p11, %s646_s14), 9  ;;  %s547_s12 = smul.u32 10, %s812_s15 }
  0x26   : > { %317 = vperm.xlu0 %605, %v307_v4   ;;  %312 = vperm.xlu1 %606, %v306_v5   ;;  %v302_v11 = vld [vmem:[%s244_s30] sm:$0xff]  ;;  %v304_v22 = vld [vmem:[%s244_s30 + $0x10] sm:$0xff]  ;;  %v305_v23 = vld [vmem:[%s244_s30 + $0x18] sm:$0xff]  ;;  %vm388_vm1 = vcmask 1041409   ;;  %vm391_vm2 = vcmask 1042434   ;;  %vm394_vm3 = vcmask 1043459  }
  0x27   : > { %607 = vset.pattern.permute.xlu2 %v664_v6  ;;  %s299_s4 = sadd.s32 %s547_s12, %s814_s14  ;;  %vm397_vm4 = vcmask 519168  }
  0x28   : > { %366 = vperm.xlu2 %607, %v363_v7   ;;  %s543_s5 = sshll.u32 %s299_s4, 2 }
  0x29   : > { %s301_s7 = scalar_lea.vmem %s798_s3, %s543_s5 }
  0x2e   : > { %322 = vperm.xlu0 %605, %v308_v8   ;;  %327 = vperm.xlu1 %606, %v309_v9  }
  0x82   : > { %v367_v31 = vpop.permute.xlu2 %366 }
  0x83   : > { %v368_v38 = vrot.slane %v367_v31, 1  ;;  %v369_v51 = vrot.slane %v367_v31, 2  ;;  %v370_v52 = vrot.slane %v367_v31, 3 }
  0x98   : > { %v318_v12 = vpop.permute.xlu0 %317  ;;  %v313_v13 = vpop.permute.xlu1 %312 }
  0x99   : > { %v331_v14 = vmul.f32 %v318_v12, %v303_v10  ;;  %v330_v15 = vmul.f32 %v313_v13, %v302_v11 }
  0x9b   : > { %v342_v16 = vsel %vm334_vm0, %v331_v14, 0.0  ;;  %v335_v17 = vsel %vm334_vm0, %v330_v15, 0.0 }
  0x9c   : > { %v343_v18 = vrot.slane %v342_v16, 4  ;;  %v336_v19 = vrot.slane %v335_v17, 4 }
  0x9e   : > { %v344_v20 = vadd.f32 %v343_v18, %v342_v16  ;;  %v337_v21 = vadd.f32 %v336_v19, %v335_v17 }
  0xa0   : > { %v345_v24 = vrot.slane %v344_v20, 2  ;;  %v338_v25 = vrot.slane %v337_v21, 2  ;;  %v323_v26 = vpop.permute.xlu0 %322  ;;  %v328_v27 = vpop.permute.xlu1 %327 }
  0xa1   : > { %v332_v28 = vmul.f32 %v323_v26, %v304_v22  ;;  %v333_v29 = vmul.f32 %v328_v27, %v305_v23 }
  0xa2   : > { %v346_v30 = vadd.f32 %v345_v24, %v344_v20  ;;  %v339_v32 = vadd.f32 %v338_v25, %v337_v21 }
  0xa3   : > { %v349_v33 = vsel %vm334_vm0, %v332_v28, 0.0  ;;  %v356_v34 = vsel %vm334_vm0, %v333_v29, 0.0 }
  0xa4   : > { %v347_v35 = vrot.slane %v346_v30, 1  ;;  %v350_v36 = vrot.slane %v349_v33, 4  ;;  %v357_v37 = vrot.slane %v356_v34, 4  ;;  %v340_v42 = vrot.slane %v339_v32, 1 }
  0xa6   : > { %v351_v39 = vadd.f32 %v350_v36, %v349_v33  ;;  %v358_v40 = vadd.f32 %v357_v37, %v356_v34  ;;  %v348_v41 = vadd.f32 %v347_v35, %v346_v30  ;;  %v341_v48 = vadd.f32 %v340_v42, %v339_v32 }
  0xa8   : > { %v352_v43 = vrot.slane %v351_v39, 2  ;;  %v359_v44 = vrot.slane %v358_v40, 2  ;;  %v376_v45 = vadd.f32 %v368_v38, %v348_v41  ;;  %v375_v56 = vadd.f32 %v367_v31, %v341_v48 }
  0xaa   : > { %v353_v46 = vadd.f32 %v352_v43, %v351_v39  ;;  %v360_v47 = vadd.f32 %v359_v44, %v358_v40  ;;  %v380_v53 = vmax.f32 %v376_v45, 0.0  ;;  %v379_v62 = vmax.f32 %v375_v56, 0.0 }
  0xac   : > { %v354_v49 = vrot.slane %v353_v46, 1  ;;  %v361_v50 = vrot.slane %v360_v47, 1  ;;  %v387_v59 = vrot.slane %v380_v53, 7 }
  0xae   : > { %v355_v54 = vadd.f32 %v354_v49, %v353_v46  ;;  %v362_v55 = vadd.f32 %v361_v50, %v360_v47  ;;  %v389_v1 = vsel %vm388_vm1, %v387_v59, %v379_v62 }
  0xb0   : > { %v377_v57 = vadd.f32 %v369_v51, %v355_v54  ;;  %v378_v58 = vadd.f32 %v370_v52, %v362_v55 }
  0xb2   : > { %v381_v60 = vmax.f32 %v377_v57, 0.0  ;;  %v382_v61 = vmax.f32 %v378_v58, 0.0 }
  0xb4   : > { %v390_v63 = vrot.slane %v381_v60, 6  ;;  %v393_v0 = vrot.slane %v382_v61, 5 }
  0xb6   : > { %v392_v2 = vsel %vm391_vm2, %v390_v63, %v389_v1 }
  0xb7   : > { %v395_v3 = vsel %vm394_vm3, %v393_v0, %v392_v2 }
  0xb8   : > { %398 = vst.msk [vmem:[%s301_s7] sm:$0xf] %vm397_vm4, %v395_v3 }
  0xb9 PF: > { %s13_s18 = sadd.s32 1, %s662_s18   ;;  %s799_s12 = smov %s642_s13 }
  0xba   : > { %p10_p12 = scmp.ge.s32.totalorder %s13_s18, 22   ;;  %s800_s13 = smov %s736_s25 }
  0xbb   : > { %s801_s14 = smov %s654_s16  ;;  %s802_s15 = smov %s658_s17 }
  0xbc   : > { %s803_s16 = smov %s806_s19  ;;  %s804_s17 = smov %s810_s20 }
  0xbd   :  { %12 = sbr.rel (!%p10_p12) target bundleno = 4 (0x4), region = 111 }

</bundles_post_ra>
